<compile_context>
chip_gen: v5e
topology: v5e:2x2
jax: 0.10.0
libtpu: 0.0.40
codegen_flags: <defaults>
</compile_context>

<pallas_src>
import functools
import math

import jax
import jax.numpy as jnp
from jax import lax
from jax.experimental import pallas as pl
from jax.experimental.pallas import tpu as pltpu

LANE = 128
_LOG_2PI = math.log(2.0 * math.pi)
_LOG_2 = math.log(2.0)


def _round_up(x, m):
    return ((x + m - 1) // m) * m


def _num_tensorcores():
    """Best-effort TC-per-chip count (2 on v7x, 1 on v5e/v6e)."""
    try:
        kind = jax.devices()[0].device_kind.lower()
        if "v7" in kind or "7x" in kind:
            return 2
    except Exception:
        pass
    return 1


def _softplus(t):
    # numerically stable softplus (keep — do NOT replace with log1p(-y^2) forms)
    return jnp.maximum(t, 0.0) + jnp.log1p(jnp.exp(-jnp.abs(t)))


def actor_kernel(x_ref, w1_ref, b1_ref, w2_ref, b2_ref, w3_ref, b3_ref, eps_ref,
                 out_ref, *, n_u, head_w, log_var_max):
    # ---- MLP: bf16 operands on the MXU, f32 accumulation / bias / ReLU
    x = x_ref[...].astype(jnp.bfloat16)
    h1 = jnp.dot(x, w1_ref[...], preferred_element_type=jnp.float32) + b1_ref[...]
    h1 = jnp.maximum(h1, 0.0).astype(jnp.bfloat16)
    h2 = jnp.dot(h1, w2_ref[...], preferred_element_type=jnp.float32) + b2_ref[...]
    h2 = jnp.maximum(h2, 0.0).astype(jnp.bfloat16)

    # ---- Fused head matmul: one N = 2*head_w (=256-wide) MXU pass.
    head = jnp.dot(h2, w3_ref[...], preferred_element_type=jnp.float32) + b3_ref[...]
    mean = head[:, :head_w]                       # lane-aligned (multiple of 128)
    # PyTorch: clamp(-10, -upper_clamp); upper_clamp = -2.0 -> clamp(-10, 2)
    log_var = jnp.clip(head[:, head_w:], -10.0, log_var_max)
    std = jnp.exp(0.5 * log_var)

    eps = eps_ref[...]                            # zero in padded lanes / rows
    z = mean + std * eps                          # Normal(mean, std).rsample()
    y = jnp.tanh(z)                               # TanhTransform

    # Normal log-prob at z (z - mean = std * eps):
    normal_lp = -0.5 * eps * eps - 0.5 * log_var - 0.5 * _LOG_2PI
    # TanhTransform.log_abs_det_jacobian(z, y) = 2 * (log 2 - z - softplus(-2z))
    ladj = 2.0 * (_LOG_2 - z - _softplus(-2.0 * z))
    lp = normal_lp - ladj

    lane = lax.broadcasted_iota(jnp.int32, lp.shape, dimension=1)
    valid = lane < n_u
    lp_sum = jnp.sum(jnp.where(valid, lp, 0.0), axis=-1, keepdims=True)

    # Lane-dense packed output: lanes [0, n_u) = y, lanes [n_u, head_w) = logp
    # (replicated).  Single unmasked full-lane store.
    out_ref[...] = jnp.where(valid, y, lp_sum).astype(out_ref.dtype)


def prepare_params(params, n_u):
    """One-time: f32 (in,out) params -> bf16 weights, fused lane-padded head.

    Call this ONCE and reuse the result every forward step (keeps the param
    prep out of the latency-critical per-step path).
    """
    w1, b1, w2, b2, w3, b3 = params
    b1 = b1.reshape(1, -1)
    b2 = b2.reshape(1, -1)
    b3 = b3.reshape(1, -1)
    head_w = _round_up(n_u + 1, LANE)             # >= one spare lane for log-prob
    pad = head_w - n_u
    # mean columns padded to head_w, log_var columns padded to head_w, fused.
    w3f = jnp.concatenate(
        [jnp.pad(w3[:, :n_u], ((0, 0), (0, pad))),
         jnp.pad(w3[:, n_u:], ((0, 0), (0, pad)))], axis=1)
    b3f = jnp.concatenate(
        [jnp.pad(b3[:, :n_u], ((0, 0), (0, pad))),
         jnp.pad(b3[:, n_u:], ((0, 0), (0, pad)))], axis=1)
    kparams = (w1.astype(jnp.bfloat16), b1.astype(jnp.float32),
               w2.astype(jnp.bfloat16), b2.astype(jnp.float32),
               w3f.astype(jnp.bfloat16), b3f.astype(jnp.float32))
    return kparams, head_w


def actor_net_probabilistic(x, kparams, eps, *, head_w, upper_clamp=-2.0,
                            tile_b=1024, return_packed=False):
    """Forward pass (is_training=True). Returns (y, y_logprob) = ((B,n_u),(B,1)).

    `kparams, head_w = prepare_params(params, n_u)` must be called once up
    front; `eps` is the standard-normal rsample noise of shape (B, n_u).
    """
    B, n_x = x.shape
    n_u = eps.shape[-1]
    w1, b1, w2, b2, w3f, b3f = kparams
    n_hidden = w1.shape[1]

    # Tile selection: big tiles amortize per-grid-step overhead; on v7x make
    # sure there are >= 2 blocks so both TensorCores get work.
    n_shards = _num_tensorcores()
    if n_shards > 1 and B > 8:
        tile_b = min(tile_b, _round_up(pl.cdiv(B, n_shards), 8))
    tile_b = max(8, min(tile_b, _round_up(B, 8)))
    b_pad = _round_up(B, tile_b)
    n_blocks = b_pad // tile_b

    x_p = jnp.pad(x.astype(jnp.float32), ((0, b_pad - B), (0, 0)))
    eps_p = jnp.pad(eps.astype(jnp.float32),
                    ((0, b_pad - B), (0, head_w - n_u)))

    def const(shape):
        # Constant index map: weights stay resident in VMEM across grid steps.
        # (pipeline_mode=pl.Buffered(1) would also drop the redundant second
        #  buffer, ~270 KB; omitted for lowering portability.)
        return pl.BlockSpec(shape, lambda i: (0, 0))

    grid_spec = pltpu.PrefetchScalarGridSpec(
        num_scalar_prefetch=0,
        grid=(n_blocks,),
        in_specs=[
            pl.BlockSpec((tile_b, n_x), lambda i: (i, 0)),        # x tile
            const((n_x, n_hidden)), const((1, n_hidden)),         # w1, b1
            const((n_hidden, n_hidden)), const((1, n_hidden)),    # w2, b2
            const((n_hidden, 2 * head_w)), const((1, 2 * head_w)),  # fused head
            pl.BlockSpec((tile_b, head_w), lambda i: (i, 0)),     # eps tile
        ],
        out_specs=pl.BlockSpec((tile_b, head_w), lambda i: (i, 0)),
    )

    packed = pl.pallas_call(
        functools.partial(actor_kernel, n_u=n_u, head_w=head_w,
                          log_var_max=float(-upper_clamp)),
        grid_spec=grid_spec,
        out_shape=jax.ShapeDtypeStruct((b_pad, head_w), jnp.float32),
        compiler_params=pltpu.CompilerParams(
            dimension_semantics=("parallel",),
            vmem_limit_bytes=32 * 1024 * 1024),
    )(x_p, w1, b1, w2, b2, w3f, b3f, eps_p)

    if return_packed:
        # Downstream consumers that can take the packed slab avoid the extra
        # HBM round-trip of the slices below (latency win for small B).
        return packed
    y = packed[:B, :n_u]
    y_logprob = packed[:B, n_u:n_u + 1]
    return y, y_logprob


# ---------------------------------------------------------------------------
# Reference (pure JAX, f32) and test harness
# ---------------------------------------------------------------------------

def reference_forward(x, params, eps, upper_clamp=-2.0):
    w1, b1, w2, b2, w3, b3 = params
    h1 = jax.nn.relu(x @ w1 + b1)
    h2 = jax.nn.relu(h1 @ w2 + b2)
    f = h2 @ w3 + b3
    n_u = eps.shape[-1]
    mean = f[:, :n_u]
    log_var = jnp.clip(f[:, n_u:], -10.0, -upper_clamp)
    std = jnp.exp(0.5 * log_var)
    z = mean + std * eps
    y = jnp.tanh(z)
    normal_lp = (-0.5 * ((z - mean) / std) ** 2 - jnp.log(std)
                 - 0.5 * math.log(2.0 * math.pi))
    ladj = 2.0 * (math.log(2.0) - z - jax.nn.softplus(-2.0 * z))
    lp = jnp.sum(normal_lp - ladj, axis=-1, keepdims=True)
    return y, lp


def init_linear(key, fan_in, fan_out):
    """PyTorch nn.Linear default init: U(-1/sqrt(fan_in), 1/sqrt(fan_in))."""
    kw, kb = jax.random.split(key)
    bound = 1.0 / math.sqrt(fan_in)
    w = jax.random.uniform(kw, (fan_in, fan_out), jnp.float32, -bound, bound)
    b = jax.random.uniform(kb, (1, fan_out), jnp.float32, -bound, bound)
    return w, b


if __name__ == "__main__":
    # Small deterministic setup: n_x = (16,), n_u = (4,), batch = 2, hidden = 256.
    B, N_X, N_U, HID = 2, 16, 4, 256

    key = jax.random.PRNGKey(0)
    k1, k2, k3, kx, keps = jax.random.split(key, 5)

    w1, b1 = init_linear(k1, N_X, HID)
    w2, b2 = init_linear(k2, HID, HID)
    w3, b3 = init_linear(k3, HID, 2 * N_U)
    params = (w1, b1, w2, b2, w3, b3)

    x = jax.random.normal(kx, (B, N_X), jnp.float32)
    eps = jax.random.normal(keps, (B, N_U), jnp.float32)   # rsample noise

    # One-time parameter prep (fused/padded/bf16), then the per-step forward.
    kparams, head_w = prepare_params(params, N_U)
    y, y_logprob = actor_net_probabilistic(x, kparams, eps, head_w=head_w)
    jax.block_until_ready((y, y_logprob))

    assert y.shape == (B, N_U) and y_logprob.shape == (B, 1)
    assert bool(jnp.all(jnp.abs(y) <= 1.0))
    assert bool(jnp.all(jnp.isfinite(y_logprob)))

    # Loose-tolerance check vs f32 reference (kernel matmuls are bf16 on MXU).
    y_ref, lp_ref = reference_forward(x, params, eps)
    assert bool(jnp.all(jnp.abs(y - y_ref) < 5e-2))
    assert bool(jnp.all(jnp.abs(y_logprob - lp_ref) < 2e-1))

    print("KERNEL_OK")
</pallas_src>

<mosaic_0001>
module attributes {stable_mosaic.version = 11 : i64} {
  func.func @actor_kernel(%arg0: i32, %arg1: memref<8x16xf32, #tpu.memory_space<vmem>>, %arg2: memref<16x256xbf16, #tpu.memory_space<vmem>>, %arg3: memref<1x256xf32, #tpu.memory_space<vmem>>, %arg4: memref<256x256xbf16, #tpu.memory_space<vmem>>, %arg5: memref<1x256xf32, #tpu.memory_space<vmem>>, %arg6: memref<256x256xbf16, #tpu.memory_space<vmem>>, %arg7: memref<1x256xf32, #tpu.memory_space<vmem>>, %arg8: memref<8x128xf32, #tpu.memory_space<vmem>>, %arg9: memref<8x128xf32, #tpu.memory_space<vmem>>) attributes {dimension_semantics = [#tpu.dimension_semantics<parallel>], iteration_bounds = array<i64: 1>, scalar_prefetch = 0 : i64, scratch_operands = 0 : i64, tpu.core_type = #tpu.core_type<tc>, window_params = [{transform_indices = @transform_0, window_bounds = array<i64: 8, 16>}, {pipeline_mode = #tpu.pipeline_mode<synchronous>, transform_indices = @transform_1, window_bounds = array<i64: 16, 256>}, {pipeline_mode = #tpu.pipeline_mode<synchronous>, transform_indices = @transform_2, window_bounds = array<i64: 1, 256>}, {pipeline_mode = #tpu.pipeline_mode<synchronous>, transform_indices = @transform_3, window_bounds = array<i64: 256, 256>}, {pipeline_mode = #tpu.pipeline_mode<synchronous>, transform_indices = @transform_4, window_bounds = array<i64: 1, 256>}, {pipeline_mode = #tpu.pipeline_mode<synchronous>, transform_indices = @transform_5, window_bounds = array<i64: 256, 256>}, {pipeline_mode = #tpu.pipeline_mode<synchronous>, transform_indices = @transform_6, window_bounds = array<i64: 1, 256>}, {transform_indices = @transform_7, window_bounds = array<i64: 8, 128>}, {transform_indices = @transform_8, window_bounds = array<i64: 8, 128>}]} {
    %c0 = arith.constant 0 : index
    %c0_0 = arith.constant 0 : index
    %0 = vector.load %arg1[%c0, %c0_0] : memref<8x16xf32, #tpu.memory_space<vmem>>, vector<8x16xf32>
    %1 = arith.truncf %0 : vector<8x16xf32> to vector<8x16xbf16>
    %c0_1 = arith.constant 0 : index
    %c0_2 = arith.constant 0 : index
    %2 = vector.load %arg2[%c0_1, %c0_2] : memref<16x256xbf16, #tpu.memory_space<vmem>>, vector<16x256xbf16>
    %cst = arith.constant dense<0.000000e+00> : vector<8x256xf32>
    %3 = tpu.matmul %1, %2, %cst {dimension_numbers = #tpu.dot_dimension_numbers<[1], [0], [0], [1], [0, 0, 1, 1], [], []>} : vector<8x16xbf16>, vector<16x256xbf16>, vector<8x256xf32> -> vector<8x256xf32>
    %c0_3 = arith.constant 0 : index
    %c0_4 = arith.constant 0 : index
    %4 = vector.load %arg3[%c0_3, %c0_4] : memref<1x256xf32, #tpu.memory_space<vmem>>, vector<1x256xf32>
    %5 = vector.broadcast %4 : vector<1x256xf32> to vector<8x256xf32>
    %6 = arith.addf %3, %5 : vector<8x256xf32>
    %cst_5 = arith.constant 0.000000e+00 : f32
    %7 = vector.broadcast %cst_5 : f32 to vector<8x256xf32>
    %8 = arith.maximumf %6, %7 : vector<8x256xf32>
    %9 = arith.truncf %8 : vector<8x256xf32> to vector<8x256xbf16>
    %c0_6 = arith.constant 0 : index
    %c0_7 = arith.constant 0 : index
    %10 = vector.load %arg4[%c0_6, %c0_7] : memref<256x256xbf16, #tpu.memory_space<vmem>>, vector<256x256xbf16>
    %cst_8 = arith.constant dense<0.000000e+00> : vector<8x256xf32>
    %11 = tpu.matmul %9, %10, %cst_8 {dimension_numbers = #tpu.dot_dimension_numbers<[1], [0], [0], [1], [0, 0, 1, 1], [], []>} : vector<8x256xbf16>, vector<256x256xbf16>, vector<8x256xf32> -> vector<8x256xf32>
    %c0_9 = arith.constant 0 : index
    %c0_10 = arith.constant 0 : index
    %12 = vector.load %arg5[%c0_9, %c0_10] : memref<1x256xf32, #tpu.memory_space<vmem>>, vector<1x256xf32>
    %13 = vector.broadcast %12 : vector<1x256xf32> to vector<8x256xf32>
    %14 = arith.addf %11, %13 : vector<8x256xf32>
    %cst_11 = arith.constant 0.000000e+00 : f32
    %15 = vector.broadcast %cst_11 : f32 to vector<8x256xf32>
    %16 = arith.maximumf %14, %15 : vector<8x256xf32>
    %17 = arith.truncf %16 : vector<8x256xf32> to vector<8x256xbf16>
    %c0_12 = arith.constant 0 : index
    %c0_13 = arith.constant 0 : index
    %18 = vector.load %arg6[%c0_12, %c0_13] : memref<256x256xbf16, #tpu.memory_space<vmem>>, vector<256x256xbf16>
    %cst_14 = arith.constant dense<0.000000e+00> : vector<8x256xf32>
    %19 = tpu.matmul %17, %18, %cst_14 {dimension_numbers = #tpu.dot_dimension_numbers<[1], [0], [0], [1], [0, 0, 1, 1], [], []>} : vector<8x256xbf16>, vector<256x256xbf16>, vector<8x256xf32> -> vector<8x256xf32>
    %c0_15 = arith.constant 0 : index
    %c0_16 = arith.constant 0 : index
    %20 = vector.load %arg7[%c0_15, %c0_16] : memref<1x256xf32, #tpu.memory_space<vmem>>, vector<1x256xf32>
    %21 = vector.broadcast %20 : vector<1x256xf32> to vector<8x256xf32>
    %22 = arith.addf %19, %21 : vector<8x256xf32>
    %23 = vector.extract_strided_slice %22 {offsets = [0, 0], sizes = [8, 128], strides = [1, 1]} : vector<8x256xf32> to vector<8x128xf32>
    %24 = vector.extract_strided_slice %22 {offsets = [0, 128], sizes = [8, 128], strides = [1, 1]} : vector<8x256xf32> to vector<8x128xf32>
    %cst_17 = arith.constant -1.000000e+01 : f32
    %cst_18 = arith.constant 2.000000e+00 : f32
    %25 = vector.broadcast %cst_17 : f32 to vector<8x128xf32>
    %26 = arith.maximumf %25, %24 : vector<8x128xf32>
    %27 = vector.broadcast %cst_18 : f32 to vector<8x128xf32>
    %28 = arith.minimumf %27, %26 : vector<8x128xf32>
    %cst_19 = arith.constant 5.000000e-01 : f32
    %29 = vector.broadcast %cst_19 : f32 to vector<8x128xf32>
    %30 = arith.mulf %29, %28 : vector<8x128xf32>
    %31 = math.exp %30 : vector<8x128xf32>
    %c0_20 = arith.constant 0 : index
    %c0_21 = arith.constant 0 : index
    %32 = vector.load %arg8[%c0_20, %c0_21] : memref<8x128xf32, #tpu.memory_space<vmem>>, vector<8x128xf32>
    %33 = arith.mulf %31, %32 : vector<8x128xf32>
    %34 = arith.addf %23, %33 : vector<8x128xf32>
    %35 = math.tanh %34 : vector<8x128xf32>
    %cst_22 = arith.constant -5.000000e-01 : f32
    %36 = vector.broadcast %cst_22 : f32 to vector<8x128xf32>
    %37 = arith.mulf %36, %32 : vector<8x128xf32>
    %38 = arith.mulf %37, %32 : vector<8x128xf32>
    %cst_23 = arith.constant 5.000000e-01 : f32
    %39 = vector.broadcast %cst_23 : f32 to vector<8x128xf32>
    %40 = arith.mulf %39, %28 : vector<8x128xf32>
    %41 = arith.subf %38, %40 : vector<8x128xf32>
    %cst_24 = arith.constant 0.918938517 : f32
    %42 = vector.broadcast %cst_24 : f32 to vector<8x128xf32>
    %43 = arith.subf %41, %42 : vector<8x128xf32>
    %cst_25 = arith.constant 0.693147182 : f32
    %44 = vector.broadcast %cst_25 : f32 to vector<8x128xf32>
    %45 = arith.subf %44, %34 : vector<8x128xf32>
    %cst_26 = arith.constant -2.000000e+00 : f32
    %46 = vector.broadcast %cst_26 : f32 to vector<8x128xf32>
    %47 = arith.mulf %46, %34 : vector<8x128xf32>
    %cst_27 = arith.constant 0.000000e+00 : f32
    %48 = vector.broadcast %cst_27 : f32 to vector<8x128xf32>
    %49 = arith.maximumf %47, %48 : vector<8x128xf32>
    %50 = math.absf %47 : vector<8x128xf32>
    %cst_28 = arith.constant 0.000000e+00 : f32
    %51 = vector.broadcast %cst_28 : f32 to vector<8x128xf32>
    %52 = arith.subf %51, %50 : vector<8x128xf32>
    %53 = math.exp %52 : vector<8x128xf32>
    %54 = math.log1p %53 : vector<8x128xf32>
    %55 = arith.addf %49, %54 : vector<8x128xf32>
    %56 = arith.subf %45, %55 : vector<8x128xf32>
    %cst_29 = arith.constant 2.000000e+00 : f32
    %57 = vector.broadcast %cst_29 : f32 to vector<8x128xf32>
    %58 = arith.mulf %57, %56 : vector<8x128xf32>
    %59 = arith.subf %43, %58 : vector<8x128xf32>
    %60 = tpu.iota {dimensions = array<i32: 1>} : vector<8x128xi32>
    %c4_i32 = arith.constant 4 : i32
    %61 = vector.broadcast %c4_i32 : i32 to vector<8x128xi32>
    %62 = arith.cmpi slt, %60, %61 : vector<8x128xi32>
    %cst_30 = arith.constant 0.000000e+00 : f32
    %63 = vector.broadcast %cst_30 : f32 to vector<8x128xf32>
    %64 = arith.select %62, %59, %63 : vector<8x128xi1>, vector<8x128xf32>
    %cst_31 = arith.constant dense<0.000000e+00> : vector<8xf32>
    %65 = vector.multi_reduction <add>, %64, %cst_31 [1] : vector<8x128xf32> to vector<8xf32>
    %66 = vector.shape_cast %65 : vector<8xf32> to vector<8x1xf32>
    %67 = vector.shape_cast %66 : vector<8x1xf32> to vector<8x1xf32>
    %68 = vector.broadcast %67 : vector<8x1xf32> to vector<8x128xf32>
    %69 = arith.select %62, %35, %68 : vector<8x128xi1>, vector<8x128xf32>
    %c0_32 = arith.constant 0 : index
    %c0_33 = arith.constant 0 : index
    %70 = vector.load %arg9[%c0_32, %c0_33] : memref<8x128xf32, #tpu.memory_space<vmem>>, vector<8x128xf32>
    tpu.vector_store %arg9[%c0_32, %c0_33], %69 {strides = array<i32>} : memref<8x128xf32, #tpu.memory_space<vmem>>, vector<8x128xf32>,
    return
  }
  func.func @transform_0(%arg0: i32) -> (i32, i32) {
    %c0_i32 = arith.constant 0 : i32
    %c0_i32_0 = arith.constant 0 : i32
    return %arg0, %c0_i32 : i32, i32
  }
  func.func @transform_1(%arg0: i32) -> (i32, i32) {
    %c0_i32 = arith.constant 0 : i32
    %c0_i32_0 = arith.constant 0 : i32
    %c0_i32_1 = arith.constant 0 : i32
    return %c0_i32, %c0_i32_0 : i32, i32
  }
  func.func @transform_2(%arg0: i32) -> (i32, i32) {
    %c0_i32 = arith.constant 0 : i32
    %c0_i32_0 = arith.constant 0 : i32
    %c0_i32_1 = arith.constant 0 : i32
    return %c0_i32, %c0_i32_0 : i32, i32
  }
  func.func @transform_3(%arg0: i32) -> (i32, i32) {
    %c0_i32 = arith.constant 0 : i32
    %c0_i32_0 = arith.constant 0 : i32
    %c0_i32_1 = arith.constant 0 : i32
    return %c0_i32, %c0_i32_0 : i32, i32
  }
  func.func @transform_4(%arg0: i32) -> (i32, i32) {
    %c0_i32 = arith.constant 0 : i32
    %c0_i32_0 = arith.constant 0 : i32
    %c0_i32_1 = arith.constant 0 : i32
    return %c0_i32, %c0_i32_0 : i32, i32
  }
  func.func @transform_5(%arg0: i32) -> (i32, i32) {
    %c0_i32 = arith.constant 0 : i32
    %c0_i32_0 = arith.constant 0 : i32
    %c0_i32_1 = arith.constant 0 : i32
    return %c0_i32, %c0_i32_0 : i32, i32
  }
  func.func @transform_6(%arg0: i32) -> (i32, i32) {
    %c0_i32 = arith.constant 0 : i32
    %c0_i32_0 = arith.constant 0 : i32
    %c0_i32_1 = arith.constant 0 : i32
    return %c0_i32, %c0_i32_0 : i32, i32
  }
  func.func @transform_7(%arg0: i32) -> (i32, i32) {
    %c0_i32 = arith.constant 0 : i32
    %c0_i32_0 = arith.constant 0 : i32
    return %arg0, %c0_i32 : i32, i32
  }
  func.func @transform_8(%arg0: i32) -> (i32, i32) {
    %c0_i32 = arith.constant 0 : i32
    %c0_i32_0 = arith.constant 0 : i32
    return %arg0, %c0_i32 : i32, i32
  }
}

</mosaic_0001>

<bundles_post_ra>
// kernel: tpu_custom_call.1
= control target key start
LH: loop header
LB: loop body
LE: loop exit
PB: predicated region body
PF: predicated region fallthrough
CT: control target
= control target key end

     0   :  { %13 = vsyncpa [#allocation3], 0  ;;  %s1358_s0 = inlined_call_operand.hbm [shape: f32[8,16], index: 0, kind: input, shape index: {}]   ;;  %s1359_s1 = inlined_call_operand.hbm [shape: bf16[16,256], index: 1, kind: input, shape index: {}]   ;;  %s1360_s2 = inlined_call_operand.hbm [shape: f32[1,256], index: 2, kind: input, shape index: {}]   ;;  %s1361_s3 = inlined_call_operand.hbm [shape: bf16[256,256], index: 3, kind: input, shape index: {}]   ;;  %s1362_s4 = inlined_call_operand.vmem [shape: f32[1,256], index: 4, kind: input, shape index: {}]   ;;  %s1363_s5 = inlined_call_operand.hbm [shape: bf16[256,256], index: 5, kind: input, shape index: {}]   ;;  %s1364_s6 = inlined_call_operand.vmem [shape: f32[1,256], index: 6, kind: input, shape index: {}]   ;;  %s1365_s7 = inlined_call_operand.hbm [shape: f32[8,128], index: 7, kind: input, shape index: {}]   ;;  %s1366_s8 = inlined_call_operand.hbm [shape: f32[8,128], index: 8, kind: output, shape index: {}]  }
   0x1   :  { %14 = vsyncpa [#allocation6], 0 }
   0x2   :  { %15 = vsyncpa [#allocation9], 0 }
   0x3   :  { %16 = vsyncpa [#allocation12], 0  ;;  %s33_s29 = sshll.u32 %s1359_s1, 4  ;;  %s34_s29 = int_to_ptr.hbm [resolvable:$true] %s33_s29 }
   0x4   :  { %17 = vsyncpa [#allocation4], 0  ;;  %s1266_s30 = smov [#allocation5]   ;;  %s57_s12 = sshll.u32 %s1361_s3, 4  ;;  %s58_s12 = int_to_ptr.hbm [resolvable:$true] %s57_s12 }
   0x5   :  { %s35_s9 = sshll.u32 %s1266_s30, 4  ;;  %s1267_s13 = smov 128   ;;  %s36_s9 = int_to_ptr.vmem [resolvable:$true] %s35_s9 }
   0x6   :  { %s1268_s14 = smov 8   ;;  %s1269_s15 = smov [#allocation8]  }
   0x7   :  { %41 = dma.hbm_to_vmem [thread:$0]  %s34_s29, 256, %s36_s9, [#allocation6], %s1267_s13, %s1267_s13, %s1268_s14  }
   0x8   :  { %s59_s16 = sshll.u32 %s1269_s15, 4  ;;  %s23_s18 = sshll.u32 %s1358_s0, 4  ;;  %s60_s16 = int_to_ptr.vmem [resolvable:$true] %s59_s16  ;;  %s24_s18 = int_to_ptr.hbm [resolvable:$true] %s23_s18 }
   0x9   :  { %65 = dma.hbm_to_vmem [thread:$0]  %s58_s12, 4096, %s60_s16, [#allocation9], %s1267_s13, %s1267_s13, %s1268_s14  }
   0xa   :  { %s47_s20 = sshll.u32 %s1360_s2, 4  ;;  %s1270_s21 = smov [#allocation2]   ;;  %s48_s20 = int_to_ptr.hbm [resolvable:$true] %s47_s20 }
   0xb   :  { %s25_s22 = sshll.u32 %s1270_s21, 4  ;;  %s1271_s23 = smov [#allocation7]   ;;  %s26_s22 = int_to_ptr.vmem [resolvable:$true] %s25_s22 }
   0xc   :  { %28 = dma.hbm_to_vmem [thread:$0]  %s24_s18, 128, %s26_s22, [#allocation3]  }
   0xd   :  { %s49_s24 = sshll.u32 %s1271_s23, 4  ;;  %s72_s0 = sshll.u32 %s1363_s5, 4  ;;  %s50_s24 = int_to_ptr.vmem [resolvable:$true] %s49_s24  ;;  %s73_s0 = int_to_ptr.hbm [resolvable:$true] %s72_s0 }
   0xe   :  { %52 = dma.hbm_to_vmem [thread:$0]  %s48_s20, 32, %s50_s24, [#allocation6]  }
   0xf   :  { %s88_s29 = sshll.u32 %s1365_s7, 4  ;;  %s1272_s30 = smov [#allocation10]   ;;  %s89_s29 = int_to_ptr.hbm [resolvable:$true] %s88_s29 }
  0x10   :  { %s74_s2 = sshll.u32 %s1272_s30, 4  ;;  %s1273_s9 = smov [#allocation11]   ;;  %s75_s2 = int_to_ptr.vmem [resolvable:$true] %s74_s2 }
  0x11   :  { %80 = dma.hbm_to_vmem [thread:$0]  %s73_s0, 4096, %s75_s2, [#allocation9], %s1267_s13, %s1267_s13, %s1268_s14  }
  0x12   :  { %s90_s10 = sshll.u32 %s1273_s9, 4  ;;  %s91_s10 = int_to_ptr.vmem [resolvable:$true] %s90_s10 }
  0x13   :  { %93 = dma.hbm_to_vmem [thread:$0]  %s89_s29, 128, %s91_s10, [#allocation12]  }
  0x14   :  { %1256 = dma.done.wait [#allocation3], 128  }
  0x15   :  { %1257 = vsyncadd [#allocation3], 4294967168 }
  0x16   :  { %1258 = dma.done.wait [#allocation6], 288  }
  0x17   :  { %1259 = vsyncadd [#allocation6], 4294967008 }
  0x18   :  { %1260 = dma.done.wait [#allocation9], 8192  }
  0x19   :  { %1261 = vsyncadd [#allocation9], 4294959104 }
  0x1a   :  { %1262 = dma.done.wait [#allocation12], 128  }
  0x1b   :  { %1263 = vsyncadd [#allocation12], 4294967168  ;;  %v740_v0 = vld [vmem:[#allocation5] sm:$0xf]  ;;  %v1006_v1 = vld [vmem:[#allocation5 + $0x4] sm:$0xf0] }
  0x1c   :  { %v1005_v2 = vld [vmem:[#allocation5 + $0x4] sm:$0xf]  ;;  %v741_v3 = vor.u32 %v1006_v1, %v740_v0  ;;  %v742_v4 = vld [vmem:[#allocation5 + $0x8] sm:$0xf0]  ;;  %v119_v5 = vld [vmem:[#allocation2] sm:$0xff]  ;;  %vm139_vm0 = vcmask 130048  }
  0x1d   :  { %v806_v6 = vld [vmem:[#allocation8 + $0x70] sm:$0xf]  ;;  %v745_v7 = vor.u32 %v1005_v2, %v742_v4  ;;  %v120_v8 = vpack.c.bf16 %v119_v5, %v119_v5  ;;  %v1022_v9 = vld [vmem:[#allocation8 + $0x74] sm:$0xf0]  ;;  %v1021_v14 = vld [vmem:[#allocation8 + $0x74] sm:$0xf] }
  0x1e   :  { %v870_v10 = vld [vmem:[#allocation8 + $0xf0] sm:$0xf]  ;;  %v1038_v11 = vld [vmem:[#allocation8 + $0xf4] sm:$0xf0]  ;;  %150 = vmatpush.bf16.msra.mxu0 %v741_v3  ;;  %v807_v12 = vor.u32 %v1022_v9, %v806_v6  ;;  %v808_v15 = vld [vmem:[#allocation8 + $0x78] sm:$0xf0] }
  0x1f   :  { %v871_v13 = vor.u32 %v1038_v11, %v870_v10  ;;  %v1037_v16 = vld [vmem:[#allocation8 + $0xf4] sm:$0xf]  ;;  %163 = vmatpush.bf16.msra.mxu1 %v745_v7  ;;  %v811_v17 = vor.u32 %v1021_v14, %v808_v15  ;;  %v872_v18 = vld [vmem:[#allocation8 + $0xf8] sm:$0xf0]  ;;  %v798_v19 = vld [vmem:[#allocation8 + $0x60] sm:$0xf] }
  0x20   :  { %v1020_v20 = vld [vmem:[#allocation8 + $0x64] sm:$0xf0]  ;;  %371 = vmatpush.bf16.msra.mxu2 %v807_v12  ;;  %v875_v21 = vor.u32 %v1037_v16, %v872_v18  ;;  %v862_v23 = vld [vmem:[#allocation8 + $0xe0] sm:$0xf]  ;;  %v1019_v25 = vld [vmem:[#allocation8 + $0x64] sm:$0xf] }
  0x21   :  { %384 = vmatpush.bf16.msra.mxu3 %v871_v13  ;;  %v799_v22 = vor.u32 %v1020_v20, %v798_v19  ;;  %v1036_v24 = vld [vmem:[#allocation8 + $0xe4] sm:$0xf0]  ;;  %746 = vmatmul.msk.bf16.vlgmr.msra.gmra.mxu0 %vm139_vm0, %v120_v8  ;;  %v800_v27 = vld [vmem:[#allocation8 + $0x68] sm:$0xf0]  ;;  %v1035_v28 = vld [vmem:[#allocation8 + $0xe4] sm:$0xf] }
  0x22   :  { %v863_v26 = vor.u32 %v1036_v24, %v862_v23  ;;  %v864_v29 = vld [vmem:[#allocation8 + $0xe8] sm:$0xf0]  ;;  %747 = vmatmul.msk.bf16.vlgmr.msra.gmra.mxu1 %vm139_vm0, %v120_v8  ;;  %397 = vmatpush.bf16.msrb.mxu0 %v811_v17  ;;  %v803_v30 = vor.u32 %v1019_v25, %v800_v27  ;;  %v790_v31 = vld [vmem:[#allocation8 + $0x50] sm:$0xf]  ;;  %v1018_v32 = vld [vmem:[#allocation8 + $0x54] sm:$0xf0] }
  0x23   :  { %v854_v33 = vld [vmem:[#allocation8 + $0xd0] sm:$0xf]  ;;  %410 = vmatpush.bf16.msrb.mxu1 %v875_v21  ;;  %v867_v34 = vor.u32 %v1035_v28, %v864_v29  ;;  %v1034_v35 = vld [vmem:[#allocation8 + $0xd4] sm:$0xf0]  ;;  %v1017_v36 = vld [vmem:[#allocation8 + $0x54] sm:$0xf]  ;;  %v791_v38 = vor.u32 %v1018_v32, %v790_v31 }
  0x24   :  { %v792_v37 = vld [vmem:[#allocation8 + $0x58] sm:$0xf0]  ;;  %372 = vmatpush.bf16.msra.mxu2 %v799_v22  ;;  %v855_v39 = vor.u32 %v1034_v35, %v854_v33  ;;  %v1033_v40 = vld [vmem:[#allocation8 + $0xd4] sm:$0xf]  ;;  %v782_v42 = vld [vmem:[#allocation8 + $0x40] sm:$0xf] }
  0x25   :  { %385 = vmatpush.bf16.msra.mxu3 %v863_v26  ;;  %v856_v41 = vld [vmem:[#allocation8 + $0xd8] sm:$0xf0]  ;;  %v1016_v43 = vld [vmem:[#allocation8 + $0x44] sm:$0xf0]  ;;  %v846_v44 = vld [vmem:[#allocation8 + $0xc0] sm:$0xf]  ;;  %v795_v46 = vor.u32 %v1017_v36, %v792_v37 }
  0x26   :  { %v1032_v45 = vld [vmem:[#allocation8 + $0xc4] sm:$0xf0]  ;;  %398 = vmatpush.bf16.msrb.mxu0 %v803_v30  ;;  %v859_v47 = vor.u32 %v1033_v40, %v856_v41  ;;  %v1015_v48 = vld [vmem:[#allocation8 + $0x44] sm:$0xf]  ;;  %v784_v49 = vld [vmem:[#allocation8 + $0x48] sm:$0xf0]  ;;  %v783_v50 = vor.u32 %v1016_v43, %v782_v42 }
  0x27   :  { %411 = vmatpush.bf16.msrb.mxu1 %v867_v34  ;;  %v847_v51 = vor.u32 %v1032_v45, %v846_v44  ;;  %v1031_v52 = vld [vmem:[#allocation8 + $0xc4] sm:$0xf]  ;;  %v848_v53 = vld [vmem:[#allocation8 + $0xc8] sm:$0xf0]  ;;  %v774_v54 = vld [vmem:[#allocation8 + $0x30] sm:$0xf]  ;;  %v787_v58 = vor.u32 %v1015_v48, %v784_v49 }
  0x28   :  { %373 = vmatpush.bf16.msra.mxu2 %v791_v38  ;;  %v1014_v55 = vld [vmem:[#allocation8 + $0x34] sm:$0xf0]  ;;  %v838_v56 = vld [vmem:[#allocation8 + $0xb0] sm:$0xf]  ;;  %v851_v59 = vor.u32 %v1031_v52, %v848_v53  ;;  %v1013_v60 = vld [vmem:[#allocation8 + $0x34] sm:$0xf] }
  0x29   :  { %386 = vmatpush.bf16.msra.mxu3 %v855_v39  ;;  %v1030_v57 = vld [vmem:[#allocation8 + $0xb4] sm:$0xf0]  ;;  %v776_v61 = vld [vmem:[#allocation8 + $0x38] sm:$0xf0]  ;;  %v775_v62 = vor.u32 %v1014_v55, %v774_v54  ;;  %v1029_v0 = vld [vmem:[#allocation8 + $0xb4] sm:$0xf] }
  0x2a   :  { %399 = vmatpush.bf16.msrb.mxu0 %v795_v46  ;;  %v839_v63 = vor.u32 %v1030_v57, %v838_v56  ;;  %v840_v1 = vld [vmem:[#allocation8 + $0xb8] sm:$0xf0]  ;;  %v766_v2 = vld [vmem:[#allocation8 + $0x20] sm:$0xf]  ;;  %v1012_v3 = vld [vmem:[#allocation8 + $0x24] sm:$0xf0]  ;;  %v779_v6 = vor.u32 %v1013_v60, %v776_v61 }
  0x2b   :  { %412 = vmatpush.bf16.msrb.mxu1 %v859_v47  ;;  %v830_v4 = vld [vmem:[#allocation8 + $0xa0] sm:$0xf]  ;;  %v1028_v5 = vld [vmem:[#allocation8 + $0xa4] sm:$0xf0]  ;;  %v843_v7 = vor.u32 %v1029_v0, %v840_v1  ;;  %v1011_v8 = vld [vmem:[#allocation8 + $0x24] sm:$0xf]  ;;  %v767_v10 = vor.u32 %v1012_v3, %v766_v2 }
  0x2c   :  { %374 = vmatpush.bf16.msra.mxu2 %v783_v50  ;;  %v768_v9 = vld [vmem:[#allocation8 + $0x28] sm:$0xf0]  ;;  %v831_v11 = vor.u32 %v1028_v5, %v830_v4  ;;  %v1027_v12 = vld [vmem:[#allocation8 + $0xa4] sm:$0xf]  ;;  %v758_v16 = vld [vmem:[#allocation8 + $0x10] sm:$0xf] }
  0x2d   :  { %387 = vmatpush.bf16.msra.mxu3 %v847_v51  ;;  %v832_v13 = vld [vmem:[#allocation8 + $0xa8] sm:$0xf0]  ;;  %v771_v14 = vor.u32 %v1011_v8, %v768_v9  ;;  %v1010_v17 = vld [vmem:[#allocation8 + $0x14] sm:$0xf0]  ;;  %v822_v18 = vld [vmem:[#allocation8 + $0x90] sm:$0xf] }
  0x2e   :  { %400 = vmatpush.bf16.msrb.mxu0 %v787_v58  ;;  %v835_v15 = vor.u32 %v1027_v12, %v832_v13  ;;  %v759_v19 = vor.u32 %v1010_v17, %v758_v16  ;;  %v1026_v20 = vld [vmem:[#allocation8 + $0x94] sm:$0xf0]  ;;  %v1009_v21 = vld [vmem:[#allocation8 + $0x14] sm:$0xf]  ;;  %v760_v22 = vld [vmem:[#allocation8 + $0x18] sm:$0xf0] }
  0x2f   :  { %413 = vmatpush.bf16.msrb.mxu1 %v851_v59  ;;  %v823_v23 = vor.u32 %v1026_v20, %v822_v18  ;;  %v763_v24 = vor.u32 %v1009_v21, %v760_v22  ;;  %v1025_v25 = vld [vmem:[#allocation8 + $0x94] sm:$0xf]  ;;  %v824_v26 = vld [vmem:[#allocation8 + $0x98] sm:$0xf0]  ;;  %v750_v28 = vld [vmem:[#allocation8] sm:$0xf] }
  0x30   :  { %375 = vmatpush.bf16.msra.mxu2 %v775_v62  ;;  %v827_v27 = vor.u32 %v1025_v25, %v824_v26  ;;  %v1008_v29 = vld [vmem:[#allocation8 + $0x4] sm:$0xf0]  ;;  %v814_v30 = vld [vmem:[#allocation8 + $0x80] sm:$0xf]  ;;  %v1007_v33 = vld [vmem:[#allocation8 + $0x4] sm:$0xf] }
  0x31   :  { %388 = vmatpush.bf16.msra.mxu3 %v839_v63  ;;  %v751_v31 = vor.u32 %v1008_v29, %v750_v28  ;;  %v1024_v32 = vld [vmem:[#allocation8 + $0x84] sm:$0xf0]  ;;  %v752_v34 = vld [vmem:[#allocation8 + $0x8] sm:$0xf0]  ;;  %v1023_v37 = vld [vmem:[#allocation8 + $0x84] sm:$0xf] }
  0x32   :  { %401 = vmatpush.bf16.msrb.mxu0 %v779_v6  ;;  %v815_v35 = vor.u32 %v1024_v32, %v814_v30  ;;  %v755_v36 = vor.u32 %v1007_v33, %v752_v34  ;;  %v816_v38 = vld [vmem:[#allocation8 + $0x88] sm:$0xf0]  ;;  %v998_v40 = vld [vmem:[#allocation10 + $0xf0] sm:$0xf]  ;;  %v1070_v41 = vld [vmem:[#allocation10 + $0xf4] sm:$0xf0] }
  0x33   :  { %414 = vmatpush.bf16.msrb.mxu1 %v843_v7  ;;  %v819_v39 = vor.u32 %v1023_v37, %v816_v38  ;;  %v1069_v42 = vld [vmem:[#allocation10 + $0xf4] sm:$0xf]  ;;  %v999_v43 = vor.u32 %v1070_v41, %v998_v40  ;;  %v1000_v44 = vld [vmem:[#allocation10 + $0xf8] sm:$0xf0]  ;;  %v990_v45 = vld [vmem:[#allocation10 + $0xe0] sm:$0xf] }
  0x34   :  { %376 = vmatpush.bf16.msra.mxu2 %v767_v10  ;;  %v1068_v46 = vld [vmem:[#allocation10 + $0xe4] sm:$0xf0]  ;;  %v1003_v47 = vor.u32 %v1069_v42, %v1000_v44  ;;  %v1067_v48 = vld [vmem:[#allocation10 + $0xe4] sm:$0xf]  ;;  %v992_v49 = vld [vmem:[#allocation10 + $0xe8] sm:$0xf0] }
  0x35   :  { %389 = vmatpush.bf16.msra.mxu3 %v831_v11  ;;  %v934_v50 = vld [vmem:[#allocation10 + $0x70] sm:$0xf]  ;;  %v991_v51 = vor.u32 %v1068_v46, %v990_v45  ;;  %v1054_v52 = vld [vmem:[#allocation10 + $0x74] sm:$0xf0]  ;;  %v1053_v53 = vld [vmem:[#allocation10 + $0x74] sm:$0xf]  ;;  %v995_v55 = vor.u32 %v1067_v48, %v992_v49 }
  0x36   :  { %402 = vmatpush.bf16.msrb.mxu0 %v771_v14  ;;  %v936_v54 = vld [vmem:[#allocation10 + $0x78] sm:$0xf0]  ;;  %v935_v56 = vor.u32 %v1054_v52, %v934_v50  ;;  %v982_v58 = vld [vmem:[#allocation10 + $0xd0] sm:$0xf]  ;;  %v1066_v59 = vld [vmem:[#allocation10 + $0xd4] sm:$0xf0] }
  0x37   :  { %415 = vmatpush.bf16.msrb.mxu1 %v835_v15  ;;  %v939_v57 = vor.u32 %v1053_v53, %v936_v54  ;;  %v1065_v60 = vld [vmem:[#allocation10 + $0xd4] sm:$0xf]  ;;  %v984_v61 = vld [vmem:[#allocation10 + $0xd8] sm:$0xf0]  ;;  %v926_v62 = vld [vmem:[#allocation10 + $0x60] sm:$0xf]  ;;  %v983_v3 = vor.u32 %v1066_v59, %v982_v58 }
  0x38   :  { %377 = vmatpush.bf16.msra.mxu2 %v759_v19  ;;  %v1052_v63 = vld [vmem:[#allocation10 + $0x64] sm:$0xf0]  ;;  %v1051_v1 = vld [vmem:[#allocation10 + $0x64] sm:$0xf]  ;;  %v928_v2 = vld [vmem:[#allocation10 + $0x68] sm:$0xf0]  ;;  %v987_v7 = vor.u32 %v1065_v60, %v984_v61 }
  0x39   :  { %390 = vmatpush.bf16.msra.mxu3 %v823_v23  ;;  %v927_v0 = vor.u32 %v1052_v63, %v926_v62  ;;  %v931_v4 = vor.u32 %v1051_v1, %v928_v2  ;;  %v974_v5 = vld [vmem:[#allocation10 + $0xc0] sm:$0xf]  ;;  %v1064_v6 = vld [vmem:[#allocation10 + $0xc4] sm:$0xf0]  ;;  %v918_v8 = vld [vmem:[#allocation10 + $0x50] sm:$0xf] }
  0x3a   :  { %403 = vmatpush.bf16.msrb.mxu0 %v763_v24  ;;  %v1050_v9 = vld [vmem:[#allocation10 + $0x54] sm:$0xf0]  ;;  %v1049_v10 = vld [vmem:[#allocation10 + $0x54] sm:$0xf]  ;;  %v1063_v11 = vld [vmem:[#allocation10 + $0xc4] sm:$0xf]  ;;  %v975_v17 = vor.u32 %v1064_v6, %v974_v5 }
  0x3b   :  { %416 = vmatpush.bf16.msrb.mxu1 %v827_v27  ;;  %v976_v12 = vld [vmem:[#allocation10 + $0xc8] sm:$0xf0]  ;;  %v920_v13 = vld [vmem:[#allocation10 + $0x58] sm:$0xf0]  ;;  %v919_v14 = vor.u32 %v1050_v9, %v918_v8  ;;  %v910_v16 = vld [vmem:[#allocation10 + $0x40] sm:$0xf] }
  0x3c   :  { %378 = vmatpush.bf16.msra.mxu2 %v751_v31  ;;  %v923_v15 = vor.u32 %v1049_v10, %v920_v13  ;;  %v1048_v18 = vld [vmem:[#allocation10 + $0x44] sm:$0xf0]  ;;  %v1047_v19 = vld [vmem:[#allocation10 + $0x44] sm:$0xf]  ;;  %v912_v20 = vld [vmem:[#allocation10 + $0x48] sm:$0xf0]  ;;  %v979_v21 = vor.u32 %v1063_v11, %v976_v12 }
  0x3d   :  { %391 = vmatpush.bf16.msra.mxu3 %v815_v35  ;;  %v966_v22 = vld [vmem:[#allocation10 + $0xb0] sm:$0xf]  ;;  %v1062_v23 = vld [vmem:[#allocation10 + $0xb4] sm:$0xf0]  ;;  %v1061_v24 = vld [vmem:[#allocation10 + $0xb4] sm:$0xf]  ;;  %v911_v26 = vor.u32 %v1048_v18, %v910_v16  ;;  %v915_v27 = vor.u32 %v1047_v19, %v912_v20 }
  0x3e   :  { %404 = vmatpush.bf16.msrb.mxu0 %v755_v36  ;;  %v968_v25 = vld [vmem:[#allocation10 + $0xb8] sm:$0xf0]  ;;  %v967_v28 = vor.u32 %v1062_v23, %v966_v22  ;;  %v958_v30 = vld [vmem:[#allocation10 + $0xa0] sm:$0xf]  ;;  %v1060_v31 = vld [vmem:[#allocation10 + $0xa4] sm:$0xf0] }
  0x3f   :  { %417 = vmatpush.bf16.msrb.mxu1 %v819_v39  ;;  %v971_v29 = vor.u32 %v1061_v24, %v968_v25  ;;  %v123_v32 = vld [vmem:[#allocation7] sm:$0x3]  ;;  %v1059_v33 = vld [vmem:[#allocation10 + $0xa4] sm:$0xf]  ;;  %v960_v34 = vld [vmem:[#allocation10 + $0xa8] sm:$0xf0]  ;;  %v959_v35 = vor.u32 %v1060_v31, %v958_v30 }
  0x40   :  { %625 = vmatpush.bf16.msrb.mxu2 %v935_v56  ;;  %v125_v36 = vperm.slane %v123_v32, 0  ;;  %v963_v37 = vor.u32 %v1059_v33, %v960_v34  ;;  %v126_v38 = vperm.slane %v123_v32, 1  ;;  %v902_v49 = vld [vmem:[#allocation10 + $0x30] sm:$0xf]  ;;  %v1046_v50 = vld [vmem:[#allocation10 + $0x34] sm:$0xf0] }
  0x41   :  { %638 = vmatpush.bf16.msrb.mxu3 %v999_v43  ;;  %v903_v52 = vor.u32 %v1046_v50, %v902_v49  ;;  %v904_v53 = vld [vmem:[#allocation10 + $0x38] sm:$0xf0]  ;;  %v1058_v56 = vld [vmem:[#allocation10 + $0x94] sm:$0xf0]  ;;  %v894_v61 = vld [vmem:[#allocation10 + $0x20] sm:$0xf] }
  0x42   :  { %651 = vmatpush.bf16.msra.mxu0 %v939_v57  ;;  %v1057_v57 = vld [vmem:[#allocation10 + $0x94] sm:$0xf]  ;;  %v952_v59 = vld [vmem:[#allocation10 + $0x98] sm:$0xf0]  ;;  %v1044_v62 = vld [vmem:[#allocation10 + $0x24] sm:$0xf0] }
  0x43   :  { %664 = vmatpush.bf16.msra.mxu1 %v1003_v47  ;;  %v955_v60 = vor.u32 %v1057_v57, %v952_v59  ;;  %v1043_v63 = vld [vmem:[#allocation10 + $0x24] sm:$0xf]  ;;  %v896_v1 = vld [vmem:[#allocation10 + $0x28] sm:$0xf0]  ;;  %v886_v9 = vld [vmem:[#allocation10 + $0x10] sm:$0xf] }
  0x44   :  { %626 = vmatpush.bf16.msrb.mxu2 %v927_v0  ;;  %v895_v0 = vor.u32 %v1044_v62, %v894_v61  ;;  %v899_v2 = vor.u32 %v1043_v63, %v896_v1  ;;  %v1055_v5 = vld [vmem:[#allocation10 + $0x84] sm:$0xf]  ;;  %v1042_v10 = vld [vmem:[#allocation10 + $0x14] sm:$0xf0]  ;;  %v1041_v12 = vld [vmem:[#allocation10 + $0x14] sm:$0xf] }
  0x45   :  { %639 = vmatpush.bf16.msrb.mxu3 %v991_v51  ;;  %v1045_v51 = vld [vmem:[#allocation10 + $0x34] sm:$0xf]  ;;  %v887_v11 = vor.u32 %v1042_v10, %v886_v9  ;;  %v888_v13 = vld [vmem:[#allocation10 + $0x18] sm:$0xf0]  ;;  %v1040_v16 = vld [vmem:[#allocation10 + $0x4] sm:$0xf0] }
  0x46   :  { %652 = vmatpush.bf16.msra.mxu0 %v931_v4  ;;  %v907_v54 = vor.u32 %v1045_v51, %v904_v53  ;;  %v1056_v4 = vld [vmem:[#allocation10 + $0x84] sm:$0xf0]  ;;  %v880_v19 = vld [vmem:[#allocation10 + $0x8] sm:$0xf0]  ;;  %v682_v59 = vld [vmem:[#allocation11] sm:$0xff]  ;;  %s725_s15 = sshll.u32 %s1366_s8, 4  ;;  %s726_s15 = int_to_ptr.hbm [resolvable:$true] %s725_s15 }
  0x47   :  { %665 = vmatpush.bf16.msra.mxu1 %v995_v55  ;;  %v950_v55 = vld [vmem:[#allocation10 + $0x90] sm:$0xf] }
  0x48   :  { %627 = vmatpush.bf16.msrb.mxu2 %v919_v14  ;;  %v951_v58 = vor.u32 %v1058_v56, %v950_v55  ;;  %v891_v14 = vor.u32 %v1041_v12, %v888_v13  ;;  %v710_v13 = vlaneseq }
  0x49   :  { %640 = vmatpush.bf16.msrb.mxu3 %v983_v3  ;;  %v942_v3 = vld [vmem:[#allocation10 + $0x80] sm:$0xf] }
  0x4a   :  { %653 = vmatpush.bf16.msra.mxu0 %v923_v15  ;;  %v943_v6 = vor.u32 %v1056_v4, %v942_v3  ;;  %v878_v15 = vld [vmem:[#allocation10] sm:$0xf] }
  0x4b   :  { %666 = vmatpush.bf16.msra.mxu1 %v987_v7  ;;  %v944_v7 = vld [vmem:[#allocation10 + $0x88] sm:$0xf0]  ;;  %v879_v18 = vor.u32 %v1040_v16, %v878_v15 }
  0x4c   :  { %628 = vmatpush.bf16.msrb.mxu2 %v911_v26  ;;  %v947_v8 = vor.u32 %v1055_v5, %v944_v7 }
  0x4d   :  { %641 = vmatpush.bf16.msrb.mxu3 %v975_v17  ;;  %v1039_v17 = vld [vmem:[#allocation10 + $0x4] sm:$0xf] }
  0x4e   :  { %654 = vmatpush.bf16.msra.mxu0 %v915_v27  ;;  %v883_v20 = vor.u32 %v1039_v17, %v880_v19  ;;  %v711_v19 = vand.u32 127, %v710_v13 }
  0x4f   :  { %667 = vmatpush.bf16.msra.mxu1 %v979_v21  ;;  %v205_v21 = vld [vmem:[%s1362_s4] sm:$0x3] }
  0x50   :  { %629 = vmatpush.bf16.msrb.mxu2 %v903_v52  ;;  %v208_v22 = vperm.slane %v205_v21, 1  ;;  %v207_v27 = vperm.slane %v205_v21, 0  ;;  %vm712_vm2 = vcmp.lt.s32.totalorder %v711_v19, 4 }
  0x51   :  { %642 = vmatpush.bf16.msrb.mxu3 %v967_v28 }
  0x52   :  { %655 = vmatpush.bf16.msra.mxu0 %v907_v54 }
  0x53   :  { %668 = vmatpush.bf16.msra.mxu1 %v971_v29 }
  0x54   :  { %630 = vmatpush.bf16.msrb.mxu2 %v895_v0 }
  0x55   :  { %643 = vmatpush.bf16.msrb.mxu3 %v959_v35 }
  0x56   :  { %656 = vmatpush.bf16.msra.mxu0 %v899_v2 }
  0x57   :  { %669 = vmatpush.bf16.msra.mxu1 %v963_v37 }
  0x58   :  { %631 = vmatpush.bf16.msrb.mxu2 %v887_v11 }
  0x59   :  { %644 = vmatpush.bf16.msrb.mxu3 %v951_v58 }
  0x5a   :  { %657 = vmatpush.bf16.msra.mxu0 %v891_v14 }
  0x5b   :  { %670 = vmatpush.bf16.msra.mxu1 %v955_v60 }
  0x5c   :  { %632 = vmatpush.bf16.msrb.mxu2 %v879_v18 }
  0x5d   :  { %645 = vmatpush.bf16.msrb.mxu3 %v943_v6  ;;  %v686_v6 = vmul.f32 -0.5, %v682_v59 }
  0x5e   :  { %658 = vmatpush.bf16.msra.mxu0 %v883_v20 }
  0x5f   :  { %671 = vmatpush.bf16.msra.mxu1 %v947_v8  ;;  %v687_v10 = vmul.f32 %v686_v6, %v682_v59 }
  0x9e   :  { %v152_v39 = vpop.f32.mrf.mxu0 }
  0x9f   :  { %v153_v40 = vadd.f32 %v152_v39, %v125_v36  ;;  %v165_v41 = vpop.f32.mrf.mxu1 }
  0xa0   :  { %v166_v42 = vadd.f32 %v165_v41, %v126_v38  ;;  %v459_v41 = vld [vmem:[%s1364_s6] sm:$0x3]  ;;  %s1274_s6 = smov [#allocation13]  }
  0xa1   :  { %v169_v43 = vmax.f32 %v153_v40, 0.0  ;;  %v461_v55 = vperm.slane %v459_v41, 0  ;;  %s723_s12 = sshll.u32 %s1274_s6, 4  ;;  %s724_s12 = int_to_ptr.vmem [resolvable:$true] %s723_s12 }
  0xa2   :  { %v170_v44 = vmax.f32 %v166_v42, 0.0  ;;  %v462_v42 = vperm.slane %v459_v41, 1 }
  0xa3   :  { %v171_v45 = vpack.c.bf16 %v169_v43, %v169_v43 }
  0xa4   :  { %v172_v46 = vpack.c.bf16 %v170_v44, %v170_v44 }
  0xa5   :  { %379 = vmatmul.bf16.vlgmr.msra.gmra.mxu2 %v171_v45  ;;  %405 = vmatmul.bf16.vlgmr.msrb.gmra.mxu0 %v171_v45 }
  0xa6   :  { %392 = vmatmul.bf16.vlgmr.msra.gmra.mxu3 %v172_v46  ;;  %418 = vmatmul.bf16.vlgmr.msrb.gmra.mxu1 %v172_v46  ;;  %v154_v47 = vpop.f32.mrf.mxu0 }
  0xa7   :  { %v167_v48 = vpop.f32.mrf.mxu1 }
 0x122   :  { %v406_v23 = vpop.f32.mrf.mxu0 }
 0x123   :  { %v407_v24 = vadd.f32 %v406_v23, %v208_v22  ;;  %v419_v25 = vpop.f32.mrf.mxu1 }
 0x125   :  { %v420_v26 = vadd.f32 %v419_v25, %v407_v24 }
 0x127   :  { %v424_v28 = vmax.f32 %v420_v26, 0.0 }
 0x128   :  { %v380_v29 = vpop.f32.mrf.mxu2 }
 0x129   :  { %v426_v30 = vpack.c.bf16 %v424_v28, %v424_v28  ;;  %v381_v31 = vadd.f32 %v380_v29, %v207_v27  ;;  %v393_v32 = vpop.f32.mrf.mxu3 }
 0x12a   :  { %v408_v33 = vpop.f32.mrf.mxu0 }
 0x12b   :  { %v394_v34 = vadd.f32 %v393_v32, %v381_v31  ;;  %v421_v35 = vpop.f32.mrf.mxu1  ;;  %646 = vmatmul.bf16.vlgmr.msrb.gmra.mxu3 %v426_v30  ;;  %672 = vmatmul.bf16.vlgmr.msra.gmra.mxu1 %v426_v30 }
 0x12d   :  { %v423_v36 = vmax.f32 %v394_v34, 0.0 }
 0x12f   :  { %v425_v37 = vpack.c.bf16 %v423_v36, %v423_v36 }
 0x130   :  { %v382_v38 = vpop.f32.mrf.mxu2 }
 0x131   :  { %v395_v39 = vpop.f32.mrf.mxu3  ;;  %633 = vmatmul.bf16.vlgmr.msrb.gmra.mxu2 %v425_v37  ;;  %659 = vmatmul.bf16.vlgmr.msra.gmra.mxu0 %v425_v37 }
 0x1a8   :  { %v673_v40 = vpop.f32.mrf.mxu1 }
 0x1ae   :  { %v647_v43 = vpop.f32.mrf.mxu3  ;;  %v660_v44 = vpop.f32.mrf.mxu0 }
 0x1af   :  { %v661_v45 = vadd.f32 %v660_v44, %v462_v42 }
 0x1b0   :  { %v675_v46 = vpop.f32.mrf.mxu1 }
 0x1b1   :  { %v674_v47 = vadd.f32 %v673_v40, %v661_v45 }
 0x1b3   :  { %v677_v48 = vmax.f32 %v674_v47, -10.0 }
 0x1b4   :  { %v634_v49 = vpop.f32.mrf.mxu2 }
 0x1b5   :  { %v678_v50 = vmin.f32 %v677_v48, 2.0  ;;  %v635_v57 = vadd.f32 %v634_v49, %v461_v55 }
 0x1b6   :  { %v649_v51 = vpop.f32.mrf.mxu3  ;;  %v662_v52 = vpop.f32.mrf.mxu0 }
 0x1b7   :  { %v679_v53 = vmul.f32 0.5, %v678_v50  ;;  %v648_v60 = vadd.f32 %v647_v43, %v635_v57 }
 0x1b9   :  { %v680_v54 = vmul.f32 1.442695, %v679_v53  ;;  %v688_v16 = vsub.f32 %v687_v10, %v679_v53 }
 0x1bb   :  { %1080 = vpow2.f32 %v680_v54  ;;  %v1004_v21 = vadd.f32 -0.9189385, %v688_v16 }
 0x1bc   :  { %v636_v56 = vpop.f32.mrf.mxu2 }
 0x1c1   :  { %v1081_v58 = vpop.eup %1080 }
 0x1c2   :  { %v683_v61 = vmul.f32 %v1081_v58, %v682_v59 }
 0x1c4   :  { %v684_v62 = vadd.f32 %v683_v61, %v648_v60 }
 0x1c6   :  { %v691_v63 = vmul.f32 -2.0, %v684_v62  ;;  %v690_v17 = vsub.f32 0.6931472, %v684_v62 }
 0x1c8   :  { %v693_v0 = vand.u32 2147483647, %v691_v63  ;;  %v692_v14 = vmax.f32 %v691_v63, 0.0 }
 0x1ca   :  { %v694_v1 = vsub.f32 0.0, %v693_v0 }
 0x1cc   :  { %v695_v2 = vmul.f32 1.442695, %v694_v1 }
 0x1ce   :  { %1082 = vpow2.f32 %v695_v2 }
 0x1d4   :  { %v1083_v3 = vpop.eup %1082 }
 0x1d5   :  { %v697_v4 = vadd.f32 1.0, %v1083_v3  ;;  %v700_v5 = vmul.f32 -0.5, %v1083_v3  ;;  %v703_v8 = vand.u32 2147483647, %v1083_v3 }
 0x1d7   :  { %1084 = vlog2.f32 %v697_v4  ;;  %v701_v7 = vadd.f32 1.0, %v700_v5  ;;  %vm704_vm1 = vcmp.lt.f32.partialorder %v703_v8, 0.0004427343 }
 0x1d8   :  { %1086 = vtanh.f32 %v684_v62 }
 0x1d9   :  { %v702_v12 = vmul.f32 %v1083_v3, %v701_v7 }
 0x1dd   :  { %v1085_v9 = vpop.eup %1084 }
 0x1de   :  { %v699_v11 = vmul.f32 0.6931472, %v1085_v9  ;;  %v1087_v25 = vpop.eup %1086 }
 0x1e0   :  { %v705_v15 = vsel %vm704_vm1, %v702_v12, %v699_v11 }
 0x1e1   :  { %v706_v18 = vadd.f32 %v705_v15, %v692_v14 }
 0x1e3   :  { %v707_v20 = vsub.f32 %v690_v17, %v706_v18 }
 0x1e5   :  { %v708_v22 = vmul.f32 2.0, %v707_v20 }
 0x1e7   :  { %v709_v23 = vsub.f32 %v1004_v21, %v708_v22 }
 0x1e9   :  { %v713_v24 = vsel %vm712_vm2, %v709_v23, 0.0 }
 0x1ea   :  { %714 = vadd.xlane.f32.xlu0 %v713_v24 }
 0x25d   :  { %v715_v26 = vpop.xlane.xlu0 %714 }
 0x25e   :  { %v716_v27 = vsel %vm712_vm2, %v1087_v25, %v715_v26 }
 0x25f   :  { %717 = vst [vmem:[#allocation13] sm:$0xff] %v716_v27 }
 0x260   :  { %728 = dma.vmem_to_hbm [thread:$0]  %s724_s12, 128, %s726_s15, [#allocation4]  }
 0x261   :  { %1264 = dma.done.wait [#allocation4], 128  }
 0x262   :  { %1265 = vsyncadd [#allocation4], 4294967168 }
 0x263   :  { %733 = vsyncpa [#allocation3], 1 }
 0x264   :  { %734 = vsyncpa [#allocation6], 1 }
 0x265   :  { %735 = vsyncpa [#allocation9], 1 }
 0x266   :  { %736 = vsyncpa [#allocation12], 1 }
 0x267   :  { %737 = vsyncpa [#allocation4], 1 }

</bundles_post_ra>
